<compile_context>
chip_gen: v5e
topology: v5e:2x2
jax: 0.10.0
libtpu: 0.0.40
codegen_flags: <defaults>
</compile_context>

<pallas_src>
import functools

import jax
import jax.numpy as jnp
from jax.experimental import pallas as pl
from jax.experimental.pallas import tpu as pltpu


def _round_up(x, m):
    return ((x + m - 1) // m) * m


def _cdiv(a, b):
    return -(-a // b)


def _device_kind():
    try:
        return jax.devices()[0].device_kind.lower()
    except Exception:
        return ""


def _default_compute_dtype():
    """bf16 matmul operands on v6e/v7x (accumulation stays f32); f32 elsewhere
    (v5e has no bf16 VPU path)."""
    kind = _device_kind()
    if ("v6" in kind) or ("v7" in kind):
        return jnp.bfloat16
    return jnp.float32


def _context_mlp_qf_kernel(n_hidden, compute_dtype, s_dim, a_dim, z_dim,
                           s_ref, a_ref, z_ref, w0_ref, b0_ref, *refs):
    """Whole-MLP hot path for one batch tile.

    refs = (W1, b1, ..., W_{n_hidden-1}, b_{n_hidden-1},
            w_out_row, b_out, out_ref, cat_scratch)
    """
    cat_ref = refs[-1]
    out_ref = refs[-2]
    w_out_ref, b_out_ref = refs[-4], refs[-3]
    mid = refs[:-4]

    # ---- Layer 0: single MXU pass --------------------------------------
    # cat([state, action, z], -1) is assembled in a small f32 VMEM scratch
    # (plain 32-bit lane-masked stores, no HBM round-trip), then the MXU runs
    # once with K = s+a+z instead of three <10%-utilized partial matmuls
    # (saves two weight push/pop sequences and the partial-sum adds per tile).
    cat_ref[:, 0:s_dim] = s_ref[...].astype(jnp.float32)
    cat_ref[:, s_dim:s_dim + a_dim] = a_ref[...].astype(jnp.float32)
    cat_ref[:, s_dim + a_dim:s_dim + a_dim + z_dim] = z_ref[...].astype(jnp.float32)

    h = jnp.dot(cat_ref[...].astype(compute_dtype), w0_ref[...],
                preferred_element_type=jnp.float32) + b0_ref[...]
    h = jnp.maximum(h, 0.0)

    # ---- Hidden layers (ReLU); bias add / ReLU stay in f32 -------------
    for l in range(n_hidden - 1):
        w = mid[2 * l][...]
        b = mid[2 * l + 1][...]
        h = jnp.dot(h.astype(compute_dtype), w,
                    preferred_element_type=jnp.float32) + b
        h = jnp.maximum(h, 0.0)

    # ---- Output layer (H -> 1) ------------------------------------------
    # VPU multiply + XLU lane reduction instead of an M=1 MXU matmul, which
    # would pay a full weight-register reload for ~block_b*H FLOPs.  The total
    # output is tiny (4 bytes/row), so the (block_b, 1) store cost is noise.
    q = jnp.sum(h * w_out_ref[...], axis=-1, keepdims=True) + b_out_ref[...]
    out_ref[...] = q.astype(out_ref.dtype)


def context_mlp_qf_forward(batch_state, batch_action, batch_z, weights, biases,
                           *, block_b=None, compute_dtype=None):
    """Pallas ContextMLPQF.forward.

    weights: list of (in_dim, out_dim) arrays (transposed vs torch.nn.Linear),
    biases:  list of (out_dim,) arrays.  Returns (batch,) f32 Q-values.

    compute_dtype: matmul-operand dtype; default = bf16 on v6e/v7x (with f32
    accumulation), f32 on everything else.  Expect ~1e-2 relative error in
    bf16 mode.
    """
    B, s_dim = batch_state.shape
    a_dim = batch_action.shape[-1]
    z_dim = batch_z.shape[-1]
    cat_dim = s_dim + a_dim + z_dim
    n_layers = len(weights)
    n_hidden = n_layers - 1
    hidden_dim = weights[0].shape[-1]
    assert n_hidden >= 1 and weights[0].shape[0] == cat_dim
    assert weights[-1].shape[-1] == 1

    if compute_dtype is None:
        compute_dtype = _default_compute_dtype()
    compute_dtype = jnp.dtype(compute_dtype)
    # bf16 packs two rows per sublane -> batch tiles must be multiples of 16.
    sub = 16 if compute_dtype.itemsize == 2 else 8

    kind = _device_kind()
    two_tc = "v7" in kind            # v7x: 2 TensorCores/chip share the grid

    # --- batch tiling -----------------------------------------------------
    # Small batches: one grid step (no per-step overhead).  Large batches:
    # choose the step count that minimizes padding (and on v7x keep an even
    # number of >= 2 steps so both TensorCores get work), with 128-row tiles.
    if block_b is None:
        cap = 512 if two_tc else 1024          # single-TC chips: bigger tiles
        if B <= cap and not (two_tc and B > 256):
            block_b = _round_up(B, sub)
        else:
            n_steps = max(2 if two_tc else 1, _cdiv(B, cap))
            if two_tc and n_steps % 2:
                n_steps += 1
            block_b = _round_up(_cdiv(B, n_steps), 128)
    block_b = _round_up(block_b, sub)
    b_pad = _round_up(B, block_b)
    grid = (b_pad // block_b,)

    def prep_input(x):
        if b_pad != B:
            x = jnp.pad(x, ((0, b_pad - B), (0, 0)))
        return x.astype(compute_dtype)

    cd = lambda x: x.astype(compute_dtype)

    state = prep_input(batch_state)
    action = prep_input(batch_action)
    z = prep_input(batch_z)

    w0 = cd(weights[0])                                         # (cat_dim, H)
    b0 = biases[0].reshape(1, -1).astype(jnp.float32)
    hidden_w = [cd(w) for w in weights[1:-1]]
    hidden_b = [b.reshape(1, -1).astype(jnp.float32) for b in biases[1:-1]]
    w_out_row = weights[-1].reshape(1, -1).astype(jnp.float32)  # (H,1)->(1,H), f32 VPU path
    b_out = biases[-1].reshape(1, 1).astype(jnp.float32)

    def batch_spec(x):
        return pl.BlockSpec((block_b, x.shape[-1]), lambda i: (i, 0))

    def resident_spec(x):
        # Constant across the grid -> single-buffer (no 2x VMEM per weight).
        return pl.BlockSpec(x.shape, lambda i: (0, 0), pipeline_mode=pl.Buffered(1))

    args = [state, action, z, w0, b0]
    in_specs = [batch_spec(state), batch_spec(action), batch_spec(z),
                resident_spec(w0), resident_spec(b0)]
    for w, b in zip(hidden_w, hidden_b):
        args += [w, b]
        in_specs += [resident_spec(w), resident_spec(b)]
    args += [w_out_row, b_out]
    in_specs += [resident_spec(w_out_row), resident_spec(b_out)]

    # --- explicit scoped-VMEM budget ---------------------------------------
    # Resident weights/biases + double-buffered batch tiles + live f32
    # activations (incl. the concat scratch), with 2x headroom; capped under
    # physical VMEM (v7x: 64 MiB/TC).  v5e's scoped default (~16 MiB) and
    # v7x's smaller VMEM both want this set explicitly.
    H = hidden_dim
    weight_bytes = (cat_dim * H + max(n_hidden - 1, 0) * H * H) * compute_dtype.itemsize \
        + (n_hidden * H + H + 2) * 4
    io_bytes = 2 * block_b * cat_dim * compute_dtype.itemsize + 2 * block_b * 4
    act_bytes = block_b * (cat_dim + 4 * H) * 4
    phys_cap = (60 << 20) if two_tc else (120 << 20)
    vmem_limit = int(min(max(32 << 20, 2 * (weight_bytes + io_bytes + act_bytes)),
                         phys_cap))

    out = pl.pallas_call(
        functools.partial(_context_mlp_qf_kernel, n_hidden, compute_dtype,
                          s_dim, a_dim, z_dim),
        out_shape=jax.ShapeDtypeStruct((b_pad, 1), jnp.float32),
        grid_spec=pltpu.PrefetchScalarGridSpec(
            num_scalar_prefetch=0,
            grid=grid,
            in_specs=in_specs,
            out_specs=pl.BlockSpec((block_b, 1), lambda i: (i, 0)),
            scratch_shapes=[pltpu.VMEM((block_b, cat_dim), jnp.float32)],
        ),
        # Batch tiles are independent -> megacore-shardable when grid > 1.
        compiler_params=pltpu.CompilerParams(
            dimension_semantics=("parallel",),
            vmem_limit_bytes=vmem_limit,
        ),
    )(*args)

    q = out.reshape(-1)                  # folds the .squeeze(-1)
    return q if b_pad == B else q[:B]


def init_context_mlp_qf_params(key, state_dim, action_dim, z_dim, hidden_dim, n_hidden):
    """Deterministic synthetic init. Layer dims: [state+z+action, hidden*n_hidden, 1]."""
    dims = [state_dim + z_dim + action_dim] + [hidden_dim] * n_hidden + [1]
    weights, biases = [], []
    for d_in, d_out in zip(dims[:-1], dims[1:]):
        kw, kb, key = jax.random.split(key, 3)
        bound = 1.0 / jnp.sqrt(d_in)  # mimic nn.Linear default uniform init
        weights.append(jax.random.uniform(kw, (d_in, d_out), jnp.float32, -bound, bound))
        biases.append(jax.random.uniform(kb, (d_out,), jnp.float32, -bound, bound))
    return weights, biases


def _reference_forward(batch_state, batch_action, batch_z, weights, biases):
    h = jnp.concatenate([batch_state, batch_action, batch_z], axis=-1)
    for l, (w, b) in enumerate(zip(weights, biases)):
        h = h @ w + b
        if l < len(weights) - 1:
            h = jnp.maximum(h, 0.0)
    return h[:, 0]


if __name__ == "__main__":
    key = jax.random.PRNGKey(0)

    batch, state_dim, action_dim, z_dim = 16, 10, 4, 6
    hidden_dim, n_hidden = 32, 2

    k_s, k_a, k_z, k_p = jax.random.split(key, 4)
    batch_state = jax.random.normal(k_s, (batch, state_dim), jnp.float32)
    batch_action = jax.random.normal(k_a, (batch, action_dim), jnp.float32)
    batch_z = jax.random.normal(k_z, (batch, z_dim), jnp.float32)

    weights, biases = init_context_mlp_qf_params(
        k_p, state_dim, action_dim, z_dim, hidden_dim, n_hidden
    )

    q = context_mlp_qf_forward(batch_state, batch_action, batch_z, weights, biases)
    q = jax.block_until_ready(q)

    q_ref = _reference_forward(batch_state, batch_action, batch_z, weights, biases)
    assert q.shape == (batch,)
    # bf16 operands (v6e/v7x auto-default) carry ~1e-2-level relative error;
    # the f32 path is effectively exact.
    cdt = jnp.dtype(_default_compute_dtype())
    tol = 1e-4 if cdt == jnp.dtype(jnp.float32) else 5e-2
    assert jnp.allclose(q, q_ref, atol=tol, rtol=tol), "mismatch vs pure-JAX reference"

    print("KERNEL_OK")
</pallas_src>

<mosaic_0001>
module attributes {stable_mosaic.version = 11 : i64} {
  func.func @_context_mlp_qf_kernel(%arg0: i32, %arg1: memref<16x10xf32, #tpu.memory_space<vmem>>, %arg2: memref<16x4xf32, #tpu.memory_space<vmem>>, %arg3: memref<16x6xf32, #tpu.memory_space<vmem>>, %arg4: memref<20x32xf32, #tpu.memory_space<vmem>>, %arg5: memref<1x32xf32, #tpu.memory_space<vmem>>, %arg6: memref<32x32xf32, #tpu.memory_space<vmem>>, %arg7: memref<1x32xf32, #tpu.memory_space<vmem>>, %arg8: memref<1x32xf32, #tpu.memory_space<vmem>>, %arg9: memref<1x1xf32, #tpu.memory_space<vmem>>, %arg10: memref<16x1xf32, #tpu.memory_space<vmem>>, %arg11: memref<16x20xf32, #tpu.memory_space<vmem>>) attributes {dimension_semantics = [#tpu.dimension_semantics<parallel>], iteration_bounds = array<i64: 1>, scalar_prefetch = 0 : i64, scratch_operands = 1 : i64, tpu.core_type = #tpu.core_type<tc>, window_params = [{transform_indices = @transform_0, window_bounds = array<i64: 16, 10>}, {transform_indices = @transform_1, window_bounds = array<i64: 16, 4>}, {transform_indices = @transform_2, window_bounds = array<i64: 16, 6>}, {pipeline_mode = #tpu.pipeline_mode<synchronous>, transform_indices = @transform_3, window_bounds = array<i64: 20, 32>}, {pipeline_mode = #tpu.pipeline_mode<synchronous>, transform_indices = @transform_4, window_bounds = array<i64: 1, 32>}, {pipeline_mode = #tpu.pipeline_mode<synchronous>, transform_indices = @transform_5, window_bounds = array<i64: 32, 32>}, {pipeline_mode = #tpu.pipeline_mode<synchronous>, transform_indices = @transform_6, window_bounds = array<i64: 1, 32>}, {pipeline_mode = #tpu.pipeline_mode<synchronous>, transform_indices = @transform_7, window_bounds = array<i64: 1, 32>}, {pipeline_mode = #tpu.pipeline_mode<synchronous>, transform_indices = @transform_8, window_bounds = array<i64: 1, 1>}, {transform_indices = @transform_9, window_bounds = array<i64: 16, 1>}]} {
    %c0 = arith.constant 0 : index
    %c0_0 = arith.constant 0 : index
    %0 = vector.load %arg1[%c0, %c0_0] : memref<16x10xf32, #tpu.memory_space<vmem>>, vector<16x10xf32>
    %c0_1 = arith.constant 0 : index
    %c0_2 = arith.constant 0 : index
    %1 = vector.load %arg11[%c0_1, %c0_2] : memref<16x20xf32, #tpu.memory_space<vmem>>, vector<16x10xf32>
    tpu.vector_store %arg11[%c0_1, %c0_2], %0 {strides = array<i32>} : memref<16x20xf32, #tpu.memory_space<vmem>>, vector<16x10xf32>,
    %c0_3 = arith.constant 0 : index
    %c0_4 = arith.constant 0 : index
    %2 = vector.load %arg2[%c0_3, %c0_4] : memref<16x4xf32, #tpu.memory_space<vmem>>, vector<16x4xf32>
    %c0_5 = arith.constant 0 : index
    %c10 = arith.constant 10 : index
    %3 = vector.load %arg11[%c0_5, %c10] : memref<16x20xf32, #tpu.memory_space<vmem>>, vector<16x4xf32>
    tpu.vector_store %arg11[%c0_5, %c10], %2 {strides = array<i32>} : memref<16x20xf32, #tpu.memory_space<vmem>>, vector<16x4xf32>,
    %c0_6 = arith.constant 0 : index
    %c0_7 = arith.constant 0 : index
    %4 = vector.load %arg3[%c0_6, %c0_7] : memref<16x6xf32, #tpu.memory_space<vmem>>, vector<16x6xf32>
    %c0_8 = arith.constant 0 : index
    %c14 = arith.constant 14 : index
    %5 = vector.load %arg11[%c0_8, %c14] : memref<16x20xf32, #tpu.memory_space<vmem>>, vector<16x6xf32>
    tpu.vector_store %arg11[%c0_8, %c14], %4 {strides = array<i32>} : memref<16x20xf32, #tpu.memory_space<vmem>>, vector<16x6xf32>,
    %c0_9 = arith.constant 0 : index
    %c0_10 = arith.constant 0 : index
    %6 = vector.load %arg11[%c0_9, %c0_10] : memref<16x20xf32, #tpu.memory_space<vmem>>, vector<16x20xf32>
    %c0_11 = arith.constant 0 : index
    %c0_12 = arith.constant 0 : index
    %7 = vector.load %arg4[%c0_11, %c0_12] : memref<20x32xf32, #tpu.memory_space<vmem>>, vector<20x32xf32>
    %cst = arith.constant dense<0.000000e+00> : vector<16x32xf32>
    %8 = tpu.matmul %6, %7, %cst {dimension_numbers = #tpu.dot_dimension_numbers<[1], [0], [0], [1], [0, 0, 1, 1], [], []>} : vector<16x20xf32>, vector<20x32xf32>, vector<16x32xf32> -> vector<16x32xf32>
    %c0_13 = arith.constant 0 : index
    %c0_14 = arith.constant 0 : index
    %9 = vector.load %arg5[%c0_13, %c0_14] : memref<1x32xf32, #tpu.memory_space<vmem>>, vector<1x32xf32>
    %10 = vector.broadcast %9 : vector<1x32xf32> to vector<16x32xf32>
    %11 = arith.addf %8, %10 : vector<16x32xf32>
    %cst_15 = arith.constant 0.000000e+00 : f32
    %12 = vector.broadcast %cst_15 : f32 to vector<16x32xf32>
    %13 = arith.maximumf %11, %12 : vector<16x32xf32>
    %c0_16 = arith.constant 0 : index
    %c0_17 = arith.constant 0 : index
    %14 = vector.load %arg6[%c0_16, %c0_17] : memref<32x32xf32, #tpu.memory_space<vmem>>, vector<32x32xf32>
    %c0_18 = arith.constant 0 : index
    %c0_19 = arith.constant 0 : index
    %15 = vector.load %arg7[%c0_18, %c0_19] : memref<1x32xf32, #tpu.memory_space<vmem>>, vector<1x32xf32>
    %cst_20 = arith.constant dense<0.000000e+00> : vector<16x32xf32>
    %16 = tpu.matmul %13, %14, %cst_20 {dimension_numbers = #tpu.dot_dimension_numbers<[1], [0], [0], [1], [0, 0, 1, 1], [], []>} : vector<16x32xf32>, vector<32x32xf32>, vector<16x32xf32> -> vector<16x32xf32>
    %17 = vector.broadcast %15 : vector<1x32xf32> to vector<16x32xf32>
    %18 = arith.addf %16, %17 : vector<16x32xf32>
    %cst_21 = arith.constant 0.000000e+00 : f32
    %19 = vector.broadcast %cst_21 : f32 to vector<16x32xf32>
    %20 = arith.maximumf %18, %19 : vector<16x32xf32>
    %c0_22 = arith.constant 0 : index
    %c0_23 = arith.constant 0 : index
    %21 = vector.load %arg8[%c0_22, %c0_23] : memref<1x32xf32, #tpu.memory_space<vmem>>, vector<1x32xf32>
    %22 = vector.broadcast %21 : vector<1x32xf32> to vector<16x32xf32>
    %23 = arith.mulf %20, %22 : vector<16x32xf32>
    %cst_24 = arith.constant dense<0.000000e+00> : vector<16xf32>
    %24 = vector.multi_reduction <add>, %23, %cst_24 [1] : vector<16x32xf32> to vector<16xf32>
    %25 = vector.shape_cast %24 : vector<16xf32> to vector<16x1xf32>
    %c0_25 = arith.constant 0 : index
    %c0_26 = arith.constant 0 : index
    %26 = vector.load %arg9[%c0_25, %c0_26] : memref<1x1xf32, #tpu.memory_space<vmem>>, vector<1x1xf32>
    %27 = vector.broadcast %26 : vector<1x1xf32> to vector<16x1xf32>
    %28 = arith.addf %25, %27 : vector<16x1xf32>
    %c0_27 = arith.constant 0 : index
    %c0_28 = arith.constant 0 : index
    %29 = vector.load %arg10[%c0_27, %c0_28] : memref<16x1xf32, #tpu.memory_space<vmem>>, vector<16x1xf32>
    tpu.vector_store %arg10[%c0_27, %c0_28], %28 {strides = array<i32>} : memref<16x1xf32, #tpu.memory_space<vmem>>, vector<16x1xf32>,
    return
  }
  func.func @transform_0(%arg0: i32) -> (i32, i32) {
    %c0_i32 = arith.constant 0 : i32
    %c0_i32_0 = arith.constant 0 : i32
    return %arg0, %c0_i32 : i32, i32
  }
  func.func @transform_1(%arg0: i32) -> (i32, i32) {
    %c0_i32 = arith.constant 0 : i32
    %c0_i32_0 = arith.constant 0 : i32
    return %arg0, %c0_i32 : i32, i32
  }
  func.func @transform_2(%arg0: i32) -> (i32, i32) {
    %c0_i32 = arith.constant 0 : i32
    %c0_i32_0 = arith.constant 0 : i32
    return %arg0, %c0_i32 : i32, i32
  }
  func.func @transform_3(%arg0: i32) -> (i32, i32) {
    %c0_i32 = arith.constant 0 : i32
    %c0_i32_0 = arith.constant 0 : i32
    %c0_i32_1 = arith.constant 0 : i32
    return %c0_i32, %c0_i32_0 : i32, i32
  }
  func.func @transform_4(%arg0: i32) -> (i32, i32) {
    %c0_i32 = arith.constant 0 : i32
    %c0_i32_0 = arith.constant 0 : i32
    %c0_i32_1 = arith.constant 0 : i32
    return %c0_i32, %c0_i32_0 : i32, i32
  }
  func.func @transform_5(%arg0: i32) -> (i32, i32) {
    %c0_i32 = arith.constant 0 : i32
    %c0_i32_0 = arith.constant 0 : i32
    %c0_i32_1 = arith.constant 0 : i32
    return %c0_i32, %c0_i32_0 : i32, i32
  }
  func.func @transform_6(%arg0: i32) -> (i32, i32) {
    %c0_i32 = arith.constant 0 : i32
    %c0_i32_0 = arith.constant 0 : i32
    %c0_i32_1 = arith.constant 0 : i32
    return %c0_i32, %c0_i32_0 : i32, i32
  }
  func.func @transform_7(%arg0: i32) -> (i32, i32) {
    %c0_i32 = arith.constant 0 : i32
    %c0_i32_0 = arith.constant 0 : i32
    %c0_i32_1 = arith.constant 0 : i32
    return %c0_i32, %c0_i32_0 : i32, i32
  }
  func.func @transform_8(%arg0: i32) -> (i32, i32) {
    %c0_i32 = arith.constant 0 : i32
    %c0_i32_0 = arith.constant 0 : i32
    %c0_i32_1 = arith.constant 0 : i32
    return %c0_i32, %c0_i32_0 : i32, i32
  }
  func.func @transform_9(%arg0: i32) -> (i32, i32) {
    %c0_i32 = arith.constant 0 : i32
    %c0_i32_0 = arith.constant 0 : i32
    return %arg0, %c0_i32 : i32, i32
  }
}

</mosaic_0001>

<bundles_post_ra>
// kernel: tpu_custom_call.1
= control target key start
LH: loop header
LB: loop body
LE: loop exit
PB: predicated region body
PF: predicated region fallthrough
CT: control target
= control target key end

     0   :  { %s391_s0 = inlined_call_operand.hbm [shape: f32[16,10], index: 0, kind: input, shape index: {}]   ;;  %s392_s1 = inlined_call_operand.vmem [shape: f32[16,4], index: 1, kind: input, shape index: {}]   ;;  %s393_s2 = inlined_call_operand.vmem [shape: f32[16,6], index: 2, kind: input, shape index: {}]   ;;  %s394_s3 = inlined_call_operand.hbm [shape: f32[20,32], index: 3, kind: input, shape index: {}]   ;;  %s395_s4 = inlined_call_operand.vmem [shape: f32[1,32], index: 4, kind: input, shape index: {}]   ;;  %s396_s5 = inlined_call_operand.vmem [shape: f32[32,32], index: 5, kind: input, shape index: {}]   ;;  %s397_s6 = inlined_call_operand.vmem [shape: f32[1,32], index: 6, kind: input, shape index: {}]   ;;  %s398_s7 = inlined_call_operand.vmem [shape: f32[1,32], index: 7, kind: input, shape index: {}]   ;;  %s399_s8 = inlined_call_operand.<no memory space> [shape: f32[1,1], index: 8, kind: input, shape index: {}]   ;;  %s400_s9 = inlined_call_operand.vmem [shape: f32[16,1], index: 9, kind: output, shape index: {}]  }
   0x1   :  { %v14_v0 = vstv %s399_s8 }
   0x2   :  { %15 = vst [vmem:[#allocation3] sm:$0x1] %v14_v0 }
   0x3   :  { %16 = vsyncpa [#allocation5], 0  ;;  %s22_s13 = sshll.u32 %s391_s0, 4  ;;  %s23_s13 = int_to_ptr.hbm [resolvable:$true] %s22_s13 }
   0x4   :  { %17 = vsyncpa [#allocation7], 0  ;;  %s283_s14 = smov [#allocation4]   ;;  %s39_s18 = sshll.u32 %s394_s3, 4  ;;  %s40_s18 = int_to_ptr.hbm [resolvable:$true] %s39_s18 }
   0x5   :  { %s24_s15 = sshll.u32 %s283_s14, 4  ;;  %s284_s19 = smov 128   ;;  %s25_s15 = int_to_ptr.vmem [resolvable:$true] %s24_s15 }
   0x6   :  { %s285_s20 = smov 8   ;;  %s286_s8 = smov [#allocation6]  }
   0x7   :  { %30 = dma.hbm_to_vmem [thread:$0]  %s23_s13, 256, %s25_s15, [#allocation5], %s284_s19, %s284_s19, %s285_s20  }
   0x8   :  { %s41_s21 = sshll.u32 %s286_s8, 4  ;;  %s42_s21 = int_to_ptr.vmem [resolvable:$true] %s41_s21 }
   0x9   :  { %47 = dma.hbm_to_vmem [thread:$0]  %s40_s18, 384, %s42_s21, [#allocation7], %s284_s19, %s284_s19, %s285_s20  }
   0xa   :  { %279 = dma.done.wait [#allocation5], 256  }
   0xb   :  { %280 = vsyncadd [#allocation5], 4294967040 }
   0xc   :  { %281 = dma.done.wait [#allocation7], 384  }
   0xd   :  { %282 = vsyncadd [#allocation7], 4294966912  ;;  %v72_v1 = vld [vmem:[%s392_s1 + $0x8] sm:$0xff]  ;;  %v71_v2 = vld [vmem:[%s392_s1] sm:$0xff]  ;;  %s287_s3 = smov 10   ;;  %s288_s29 = smov 14  }
   0xe   :  { %77 = vrot.lane.b32.xlu0 %v72_v1, %s287_s3  ;;  %75 = vrot.lane.b32.xlu1 %v71_v2, %s287_s3  ;;  %v85_v3 = vld [vmem:[%s393_s2 + $0x8] sm:$0xff]  ;;  %v84_v4 = vld [vmem:[%s393_s2] sm:$0xff]  ;;  %vm68_vm0 = vcmask 80896   ;;  %v66_v6 = vld [vmem:[#allocation4] sm:$0xff]  ;;  %vm113_vm1 = vcmask 1043456   ;;  %vm81_vm2 = vcmask 113744  }
   0xf   :  { %v67_v5 = vld [vmem:[#allocation4 + $0x8] sm:$0xff]  ;;  %69 = vst.msk [vmem:[#allocation2] sm:$0xff] %vm68_vm0, %v66_v6  ;;  %v101_v7 = vld [vmem:[#allocation6 + $0x10] sm:$0xf]  ;;  %v100_v8 = vld [vmem:[#allocation6 + $0x8] sm:$0xff]  ;;  %vm94_vm3 = vcmask 162928  }
  0x10   :  { %70 = vst.msk [vmem:[#allocation2 + $0x8] sm:$0xff] %vm68_vm0, %v67_v5  ;;  %214 = vmatpush.msk.msra.mxu3 %vm113_vm1, %v101_v7  ;;  %209 = vmatpush.msk.msra.mxu0 %vm113_vm1, %v101_v7  ;;  %v99_v9 = vld [vmem:[#allocation6] sm:$0xff]  ;;  %v145_v10 = vld [vmem:[%s396_s5 + $0x18] sm:$0xff]  ;;  %vm106_vm4 = vcmask 162816   ;;  %v144_v17 = vld [vmem:[%s396_s5 + $0x10] sm:$0xff]  ;;  %vm150_vm5 = vcmask 261120  }
  0x11   :  { %169 = vmatpush.msra.mxu1 %v145_v10  ;;  %217 = vmatpush.msra.mxu2 %v145_v10  ;;  %v143_v18 = vld [vmem:[%s396_s5 + $0x8] sm:$0xff]  ;;  %v142_v19 = vld [vmem:[%s396_s5] sm:$0xff]  ;;  %v230_v39 = vld [vmem:[#allocation3] ss:$0 sm:$0xff]  ;;  %vm200_vm6 = vcmask 7168  }
  0x12   :  { %215 = vmatpush.msra.mxu3 %v100_v8  ;;  %131 = vmatpush.msra.mxu0 %v100_v8  ;;  %v227_v20 = vld [vmem:[%s395_s4] ss:$0 sm:$0xff] }
  0x13   :  { %170 = vmatpush.msra.mxu1 %v144_v17  ;;  %218 = vmatpush.msra.mxu2 %v144_v17  ;;  %v228_v27 = vld [vmem:[%s397_s6] ss:$0 sm:$0xff] }
  0x14   :  { %216 = vmatpush.msra.mxu3 %v99_v9  ;;  %132 = vmatpush.msra.mxu0 %v99_v9  ;;  %v229_v30 = vld [vmem:[%s398_s7] ss:$0 sm:$0xff] }
  0x15   :  { %171 = vmatpush.msra.mxu1 %v143_v18  ;;  %219 = vmatpush.msra.mxu2 %v143_v18 }
  0x16   :  { %90 = vrot.lane.b32.xlu0 %v85_v3, %s288_s29  ;;  %88 = vrot.lane.b32.xlu1 %v84_v4, %s288_s29 }
  0x17   :  { %172 = vmatpush.msra.mxu1 %v142_v19  ;;  %220 = vmatpush.msra.mxu2 %v142_v19 }
  0x80   :  { %v78_v11 = vpop.permute.xlu0 %77  ;;  %v76_v12 = vpop.permute.xlu1 %75 }
  0x81   :  { %83 = vst.msk [vmem:[#allocation2 + $0x8] sm:$0xff] %vm81_vm2, %v78_v11 }
  0x82   :  { %82 = vst.msk [vmem:[#allocation2] sm:$0xff] %vm81_vm2, %v76_v12 }
  0x88   :  { %v91_v13 = vpop.permute.xlu0 %90  ;;  %v89_v14 = vpop.permute.xlu1 %88 }
  0x89   :  { %96 = vst.msk [vmem:[#allocation2 + $0x8] sm:$0xff] %vm94_vm3, %v91_v13 }
  0x8a   :  { %95 = vst.msk [vmem:[#allocation2] sm:$0xff] %vm94_vm3, %v89_v14 }
  0x90   :  { %v98_v15 = vld [vmem:[#allocation2 + $0x8] sm:$0xff] }
  0x91   :  { %211 = vmatmul.msk.f32.vlgmr.msra.gmra.mxu3 %vm106_vm4, %v98_v15  ;;  %v97_v16 = vld [vmem:[#allocation2] sm:$0xff] }
  0x92   :  { %210 = vmatmul.msk.f32.vlgmr.msra.gmra.mxu0 %vm106_vm4, %v97_v16 }
 0x10f   :  { %v134_v21 = vpop.f32.mrf.mxu0 }
 0x110   :  { %v135_v22 = vadd.f32 %v227_v20, %v134_v21 }
 0x112   :  { %v140_v23 = vmax.f32 %v135_v22, 0.0 }
 0x114   :  { %v137_v24 = vpop.f32.mrf.mxu3  ;;  %212 = vmatmul.msk.f32.vlgmr.msra.gmra.mxu1 %vm150_vm5, %v140_v23 }
 0x115   :  { %v138_v25 = vadd.f32 %v227_v20, %v137_v24 }
 0x117   :  { %v141_v26 = vmax.f32 %v138_v25, 0.0 }
 0x119   :  { %213 = vmatmul.msk.f32.vlgmr.msra.gmra.mxu2 %vm150_vm5, %v141_v26 }
 0x191   :  { %v174_v28 = vpop.f32.mrf.mxu1 }
 0x192   :  { %v175_v29 = vadd.f32 %v228_v27, %v174_v28 }
 0x194   :  { %v180_v31 = vmax.f32 %v175_v29, 0.0 }
 0x196   :  { %v186_v32 = vmul.f32 %v229_v30, %v180_v31 }
 0x198   :  { %v188_v33 = vsel %vm150_vm5, %v186_v32, 0.0 }
 0x199   :  { %189 = vadd.xlane.f32.xlu2 %v188_v33 }
 0x19c   :  { %v177_v34 = vpop.f32.mrf.mxu2 }
 0x19d   :  { %v178_v35 = vadd.f32 %v228_v27, %v177_v34 }
 0x19f   :  { %v181_v36 = vmax.f32 %v178_v35, 0.0 }
 0x1a1   :  { %v187_v37 = vmul.f32 %v229_v30, %v181_v36 }
 0x1a3   :  { %v191_v38 = vsel %vm150_vm5, %v187_v37, 0.0 }
 0x1a4   :  { %192 = vadd.xlane.f32.xlu2 %v191_v38 }
 0x20c   :  { %v190_v40 = vpop.xlane.xlu2 %189 }
 0x20d   :  { %v198_v41 = vadd.f32 %v230_v39, %v190_v40 }
 0x20f   :  { %201 = vst.msk [vmem:[%s400_s9] sm:$0xff] %vm200_vm6, %v198_v41 }
 0x217   :  { %v193_v42 = vpop.xlane.xlu2 %192 }
 0x218   :  { %v199_v43 = vadd.f32 %v230_v39, %v193_v42 }
 0x21a   :  { %202 = vst.msk [vmem:[%s400_s9 + $0x8] sm:$0xff] %vm200_vm6, %v199_v43 }
 0x21b   :  { %207 = vsyncpa [#allocation5], 1 }
 0x21c   :  { %208 = vsyncpa [#allocation7], 1 }

</bundles_post_ra>
